<compile_context>
chip_gen: v7x
topology: tpu7x:2x2x1
jax: 0.10.0
libtpu: 0.0.40
codegen_flags: <defaults>
</compile_context>

<pallas_src>
import functools

import jax
import jax.numpy as jnp
from jax.experimental import pallas as pl
from jax.experimental.pallas import tpu as pltpu


def _channel_attention_kernel(c_ref, w1_ref, b1_ref, w2_ref, b2_ref, o_ref,
                              *, feat_c, matmul_dtype):
    # Two small MXU matmuls + ReLU + scalar scale, fused in one kernel,
    # everything resident in VMEM (no grid, no pipelining).
    c = c_ref[...]                       # (B, c_dim)
    w1 = w1_ref[...]                     # (c_dim, feat_c)
    w2 = w2_ref[...]                     # (feat_c, feat_c)
    if matmul_dtype != c.dtype:
        c = c.astype(matmul_dtype)
        w1 = w1.astype(matmul_dtype)
        w2 = w2.astype(matmul_dtype)

    h = jnp.dot(c, w1, preferred_element_type=jnp.float32) + b1_ref[...]
    h = jnp.maximum(h, 0.0)              # ReLU
    if matmul_dtype != h.dtype:
        h = h.astype(matmul_dtype)
    y = jnp.dot(h, w2, preferred_element_type=jnp.float32) + b2_ref[...]

    # forward(): return self.feat_c * channel_mask  (self.feat_c is the int channel count)
    o_ref[...] = (jnp.float32(feat_c) * y).astype(o_ref.dtype)


def channel_attention_mask(c, w1, b1, w2, b2, *, feat_c, matmul_dtype=jnp.float32):
    """c: (B, c_dim) float32. Returns (B, feat_c, 1, 1) float32 (NCHW).

    For large production shapes, pass matmul_dtype=jnp.bfloat16 to double MXU
    throughput (accumulation stays f32 via preferred_element_type).
    """
    B, c_dim = c.shape
    assert w1.shape == (c_dim, feat_c)
    assert b1.shape == (1, feat_c)
    assert w2.shape == (feat_c, feat_c)
    assert b2.shape == (1, feat_c)

    # Advisory cost hint for XLA's scheduler.
    flops = 2 * B * feat_c * (c_dim + feat_c)
    bytes_accessed = 4 * (c.size + w1.size + b1.size + w2.size + b2.size + B * feat_c)
    cost = pl.CostEstimate(flops=flops, transcendentals=0, bytes_accessed=bytes_accessed)

    kernel = functools.partial(
        _channel_attention_kernel, feat_c=feat_c, matmul_dtype=matmul_dtype)

    # Gridless call: every operand is tiny, so keep whole arrays in VMEM with no
    # grid loop / double buffering.
    out2d = pl.pallas_call(
        kernel,
        out_shape=jax.ShapeDtypeStruct((B, feat_c), jnp.float32),
        in_specs=[pl.BlockSpec(memory_space=pltpu.MemorySpace.VMEM)] * 5,
        out_specs=pl.BlockSpec(memory_space=pltpu.MemorySpace.VMEM),
        cost_estimate=cost,
    )(c, w1, b1, w2, b2)

    # Glue: UnFlatten(1) -> (B, feat_c, 1, 1), matching PyTorch NCHW output.
    return out2d.reshape(B, feat_c, 1, 1)


def init_params(key, c_dim, feat_c, feat_hw):
    """Deterministic parameter init mirroring the module's shapes."""
    k_inst, k_w1, k_b1, k_w2, k_b2 = jax.random.split(key, 5)
    # nn.Parameter(torch.randn(1, feat_c, feat_hw * feat_hw))  (unused in forward)
    instance_attention = jax.random.normal(
        k_inst, (1, feat_c, feat_hw * feat_hw), jnp.float32)
    # Linear(c_dim, feat_c): PyTorch-style uniform(-1/sqrt(fan_in), 1/sqrt(fan_in))
    bnd1 = 1.0 / jnp.sqrt(jnp.float32(c_dim))
    w1 = jax.random.uniform(k_w1, (c_dim, feat_c), jnp.float32, -bnd1, bnd1)
    b1 = jax.random.uniform(k_b1, (1, feat_c), jnp.float32, -bnd1, bnd1)
    # Linear(feat_c, feat_c)
    bnd2 = 1.0 / jnp.sqrt(jnp.float32(feat_c))
    w2 = jax.random.uniform(k_w2, (feat_c, feat_c), jnp.float32, -bnd2, bnd2)
    b2 = jax.random.uniform(k_b2, (1, feat_c), jnp.float32, -bnd2, bnd2)
    return instance_attention, w1, b1, w2, b2


if __name__ == "__main__":
    # Small shapes consistent with the module's forward.
    B, c_dim, feat_c, feat_hw = 2, 8, 32, 4

    key = jax.random.PRNGKey(0)
    k_params, k_input = jax.random.split(key)
    _instance_attention, w1, b1, w2, b2 = init_params(k_params, c_dim, feat_c, feat_hw)
    c = jax.random.normal(k_input, (B, c_dim), jnp.float32)

    out = channel_attention_mask(c, w1, b1, w2, b2, feat_c=feat_c)
    out = jax.block_until_ready(out)

    # Pure-JAX reference check (matches the PyTorch forward exactly:
    # scalar feat_c * MLP(c), reshaped to (B, feat_c, 1, 1)).
    ref = feat_c * (jnp.maximum(c @ w1 + b1, 0.0) @ w2 + b2)
    ref = ref.reshape(B, feat_c, 1, 1)
    assert out.shape == (B, feat_c, 1, 1)
    assert jnp.allclose(out, ref, atol=1e-4, rtol=1e-4)

    print("KERNEL_OK")
</pallas_src>

<mosaic_0001>
module attributes {stable_mosaic.version = 11 : i64} {
  func.func @_channel_attention_kernel(%arg0: memref<2x8xf32, #tpu.memory_space<vmem>>, %arg1: memref<8x32xf32, #tpu.memory_space<vmem>>, %arg2: memref<1x32xf32, #tpu.memory_space<vmem>>, %arg3: memref<32x32xf32, #tpu.memory_space<vmem>>, %arg4: memref<1x32xf32, #tpu.memory_space<vmem>>, %arg5: memref<2x32xf32, #tpu.memory_space<vmem>>) attributes {dimension_semantics = [], scalar_prefetch = 0 : i64, scratch_operands = 0 : i64, tpu.core_type = #tpu.core_type<tc>} {
    %c0 = arith.constant 0 : index
    %c0_0 = arith.constant 0 : index
    %0 = vector.load %arg0[%c0, %c0_0] : memref<2x8xf32, #tpu.memory_space<vmem>>, vector<2x8xf32>
    %c0_1 = arith.constant 0 : index
    %c0_2 = arith.constant 0 : index
    %1 = vector.load %arg1[%c0_1, %c0_2] : memref<8x32xf32, #tpu.memory_space<vmem>>, vector<8x32xf32>
    %c0_3 = arith.constant 0 : index
    %c0_4 = arith.constant 0 : index
    %2 = vector.load %arg3[%c0_3, %c0_4] : memref<32x32xf32, #tpu.memory_space<vmem>>, vector<32x32xf32>
    %cst = arith.constant dense<0.000000e+00> : vector<2x32xf32>
    %3 = tpu.matmul %0, %1, %cst {dimension_numbers = #tpu.dot_dimension_numbers<[1], [0], [0], [1], [0, 0, 1, 1], [], []>} : vector<2x8xf32>, vector<8x32xf32>, vector<2x32xf32> -> vector<2x32xf32>
    %c0_5 = arith.constant 0 : index
    %c0_6 = arith.constant 0 : index
    %4 = vector.load %arg2[%c0_5, %c0_6] : memref<1x32xf32, #tpu.memory_space<vmem>>, vector<1x32xf32>
    %5 = vector.broadcast %4 : vector<1x32xf32> to vector<2x32xf32>
    %6 = arith.addf %3, %5 : vector<2x32xf32>
    %cst_7 = arith.constant 0.000000e+00 : f32
    %7 = vector.broadcast %cst_7 : f32 to vector<2x32xf32>
    %8 = arith.maximumf %6, %7 : vector<2x32xf32>
    %cst_8 = arith.constant dense<0.000000e+00> : vector<2x32xf32>
    %9 = tpu.matmul %8, %2, %cst_8 {dimension_numbers = #tpu.dot_dimension_numbers<[1], [0], [0], [1], [0, 0, 1, 1], [], []>} : vector<2x32xf32>, vector<32x32xf32>, vector<2x32xf32> -> vector<2x32xf32>
    %c0_9 = arith.constant 0 : index
    %c0_10 = arith.constant 0 : index
    %10 = vector.load %arg4[%c0_9, %c0_10] : memref<1x32xf32, #tpu.memory_space<vmem>>, vector<1x32xf32>
    %11 = vector.broadcast %10 : vector<1x32xf32> to vector<2x32xf32>
    %12 = arith.addf %9, %11 : vector<2x32xf32>
    %cst_11 = arith.constant 3.200000e+01 : f32
    %13 = vector.broadcast %cst_11 : f32 to vector<2x32xf32>
    %14 = arith.mulf %13, %12 : vector<2x32xf32>
    %c0_12 = arith.constant 0 : index
    %c0_13 = arith.constant 0 : index
    %15 = vector.load %arg5[%c0_12, %c0_13] : memref<2x32xf32, #tpu.memory_space<vmem>>, vector<2x32xf32>
    tpu.vector_store %arg5[%c0_12, %c0_13], %14 {strides = array<i32>} : memref<2x32xf32, #tpu.memory_space<vmem>>, vector<2x32xf32>,
    return
  }
}

</mosaic_0001>

<bundles_post_ra>
// kernel: tpu_custom_call.1
= control target key start
LH: loop header
LB: loop body
LE: loop exit
PB: predicated region body
PF: predicated region fallthrough
CT: control target
= control target key end

     0   :  { %10 = vsyncpa [#allocation3], 0  ;;  %s475_s0 = inlined_call_operand.hbm [shape: f32[2,8], index: 0, kind: input, shape index: {}]   ;;  %s476_s1 = inlined_call_operand.hbm [shape: f32[8,32], index: 1, kind: input, shape index: {}]   ;;  %s477_s2 = inlined_call_operand.vmem [shape: f32[1,32], index: 2, kind: input, shape index: {}]   ;;  %s478_s3 = inlined_call_operand.hbm [shape: f32[32,32], index: 3, kind: input, shape index: {}]   ;;  %s479_s4 = inlined_call_operand.vmem [shape: f32[1,32], index: 4, kind: input, shape index: {}]   ;;  %s480_s5 = inlined_call_operand.hbm [shape: f32[2,32], index: 5, kind: output, shape index: {}]  }
   0x1   :  { %11 = vsyncpa [#allocation6], 0 }
   0x2   :  { %12 = vsyncpa [#allocation4], 0  ;;  %s382_s18 = smov [#allocation5]   ;;  %s383_s20 = smov [#allocation2]  }
   0x3   :  { %s29_s19 = sshll.u32 %s382_s18, 4  ;;  %s19_s21 = sshll.u32 %s383_s20, 4  ;;  %s30_s19 = int_to_ptr.vmem [resolvable:$true] %s29_s19  ;;  %s20_s21 = int_to_ptr.vmem [resolvable:$true] %s19_s21 }
   0x4   :  { %s288_s24 = scalar_lea.hbm %s476_s1, 128 }
   0x5   :  { %p289_p0 = scmp.ne.s32.totalorder %s476_s1, %s288_s24  ;;  %p292_p1 = scmp.lt.u32.totalorder %s288_s24, %s476_s1 }
   0x7   :  { %p294_p2 = pnand %p292_p1, %p289_p0 }
   0x9   :  { %297 = shalt.err (!%p294_p2)
}
   0xa   :  { %s298_s29 = scalar_lea.vmem %s30_s19, 128  ;;  %p303_p4 = scmp.lt.s32.totalorder %s30_s19, %s30_s19 }
   0xb   :  { %p299_p3 = scmp.ne.s32.totalorder %s30_s19, %s298_s29  ;;  %p304_p5 = scmp.lt.s32.totalorder %s298_s29, %s298_s29 }
   0xd   :  { %p305_p6 = por %p304_p5, %p303_p4 }
   0xf   :  { %p306_p7 = pnand %p305_p6, %p299_p3 }
  0x11   :  { %309 = shalt.err (!%p306_p7)
}
  0x12   :  { %32 = dma.hbm_to_vmem [thread:$0]  %s476_s1, 128, %s30_s19, [#allocation6]  }
  0x13   :  { %s310_s9 = scalar_lea.hbm %s475_s0, 32 }
  0x14   :  { %p311_p8 = scmp.ne.s32.totalorder %s475_s0, %s310_s9  ;;  %p314_p9 = scmp.lt.u32.totalorder %s310_s9, %s475_s0 }
  0x16   :  { %p316_p10 = pnand %p314_p9, %p311_p8 }
  0x18   :  { %319 = shalt.err (!%p316_p10)
}
  0x19   :  { %s320_s14 = scalar_lea.vmem %s20_s21, 32  ;;  %p325_p12 = scmp.lt.s32.totalorder %s20_s21, %s20_s21 }
  0x1a   :  { %p321_p11 = scmp.ne.s32.totalorder %s20_s21, %s320_s14  ;;  %p326_p13 = scmp.lt.s32.totalorder %s320_s14, %s320_s14 }
  0x1c   :  { %p327_p0 = por %p326_p13, %p325_p12 }
  0x1e   :  { %p328_p1 = pnand %p327_p0, %p321_p11 }
  0x20   :  { %331 = shalt.err (!%p328_p1)
}
  0x21   :  { %22 = dma.hbm_to_vmem [thread:$0]  %s475_s0, 32, %s20_s21, [#allocation3]  }
  0x22   :  { %s384_s16 = smov [#allocation7]   ;;  %s332_s20 = scalar_lea.hbm %s478_s3, 512 }
  0x23   :  { %s40_s17 = sshll.u32 %s384_s16, 4  ;;  %p333_p2 = scmp.ne.s32.totalorder %s478_s3, %s332_s20  ;;  %s41_s17 = int_to_ptr.vmem [resolvable:$true] %s40_s17 }
  0x24   :  { %p336_p3 = scmp.lt.u32.totalorder %s332_s20, %s478_s3 }
  0x26   :  { %p338_p4 = pnand %p336_p3, %p333_p2 }
  0x28   :  { %341 = shalt.err (!%p338_p4)
}
  0x29   :  { %s342_s26 = scalar_lea.vmem %s41_s17, 512  ;;  %p347_p6 = scmp.lt.s32.totalorder %s41_s17, %s41_s17 }
  0x2a   :  { %p343_p5 = scmp.ne.s32.totalorder %s41_s17, %s342_s26  ;;  %p348_p7 = scmp.lt.s32.totalorder %s342_s26, %s342_s26 }
  0x2c   :  { %p349_p8 = por %p348_p7, %p347_p6 }
  0x2e   :  { %p350_p9 = pnand %p349_p8, %p343_p5 }
  0x30   :  { %353 = shalt.err (!%p350_p9)
}
  0x31   :  { %s385_s0 = smov 128   ;;  %s386_s21 = smov 8  }
  0x32   :  { %46 = dma.hbm_to_vmem [thread:$0]  %s478_s3, 512, %s41_s17, [#allocation6], %s385_s0, %s385_s0, %s386_s21  }
  0x33   :  { %376 = dma.done.wait [#allocation3], 32  }
  0x34   :  { %377 = vsyncadd [#allocation3], 4294967264 }
  0x35   :  { %378 = dma.done.wait [#allocation6], 640  }
  0x36   :  { %379 = vsyncadd [#allocation6], 4294966656  ;;  %v387_v0 = vmov 0.0   ;;  %vm388_vm0 = vmmov 0   ;;  %v389_v1 = vmov 0.0|0.0   ;;  %vm71_vm1 = vcmask 64512  }
  0x37   :  { %257 = vmatprep.subr.mxu0 %v387_v0  ;;  %259 = vmatprep.mubr.msk.f32.mxu0 %vm388_vm0, %v387_v0  ;;  %v59_v2 = vld [vmem:[#allocation5] sm:$0xff]  ;;  %v58_v3 = vld [vmem:[#allocation2] sm:$0x3]  ;;  %v60_v4 = vld [vmem:[#allocation7] sm:$0xff]  ;;  %vm153_vm2 = vcmask 261120   ;;  %s390_s7 = smov [#allocation8]  }
  0x38   :  { %273 = vmatprep.subr.bf16.mxu1 %v389_v1  ;;  %270 = vmatprep.mubr.msk.f32.mxu1 %vm388_vm0, %v387_v0  ;;  %v61_v5 = vld [vmem:[#allocation7 + $0x8] sm:$0xff]  ;;  %v62_v7 = vld [vmem:[#allocation7 + $0x10] sm:$0xff]  ;;  %v63_v8 = vld [vmem:[#allocation7 + $0x18] sm:$0xff]  ;;  %s236_s8 = sshll.u32 %s390_s7, 4  ;;  %vm228_vm3 = vcmask 254976   ;;  %s237_s8 = int_to_ptr.vmem [resolvable:$true] %s236_s8 }
  0x39   :  { %258 = vmatpush3.msra.mxu0 %v59_v2  ;;  %v274_v6 = vpack.c.bf16 %v61_v5, %v60_v4  ;;  %v277_v9 = vpack.c.bf16 %v63_v8, %v62_v7  ;;  %v246_v10 = vld [vmem:[%s477_s2] ss:$0 sm:$0xff]  ;;  %s354_s2 = scalar_lea.vmem %s237_s8, 32  ;;  %p359_p11 = scmp.lt.s32.totalorder %s237_s8, %s237_s8 }
  0x3a   :  { %260 = vmatmul.mubr.msk.f32.vlgmr.msra.gmra.mrb[0].mxu0 %vm71_vm1, %v58_v3  ;;  %v248_v15 = vld [vmem:[%s479_s4] ss:$0 sm:$0xff]  ;;  %p355_p10 = scmp.ne.s32.totalorder %s237_s8, %s354_s2  ;;  %p360_p12 = scmp.lt.s32.totalorder %s354_s2, %s354_s2 }
  0x3b   :  { %275 = vmatpush3.bf16.msra.mxu1 %v274_v6 }
  0x3c   :  { %276 = vmatprep.subr.bf16.mxu1 %v389_v1  ;;  %p361_p13 = por %p360_p12, %p359_p11 }
  0x3e   :  { %p362_p0 = pnand %p361_p13, %p355_p10 }
  0x3f   :  { %278 = vmatpush3.bf16.msra.mxu1 %v277_v9 }
 0x10d   :  { %v141_v11 = vpop.f32.mrb[0].mxu0 }
 0x10e   :  { %v142_v12 = vadd.f32 %v246_v10, %v141_v11  ;;  %v261_v13 = vpop.f32.mrb[1].mxu0 }
 0x110   :  { %v145_v14 = vmax.f32 %v142_v12, 0.0 }
 0x112   :  { %271 = vmatmul.mubr.msk.f32.vlgmr.msra.gmra.mrb[0].mxu1 %vm153_vm2, %v145_v14 }
 0x1e5   :  { %v223_v16 = vpop.f32.mrb[0].mxu1 }
 0x1e6   :  { %v224_v17 = vadd.f32 %v248_v15, %v223_v16  ;;  %v272_v18 = vpop.f32.mrb[1].mxu1 }
 0x1e8   :  { %v227_v19 = vmul.f32 32.0, %v224_v17 }
 0x1ea   :  { %229 = vst.msk [vmem:[#allocation8] sm:$0x3] %vm228_vm3, %v227_v19 }
 0x1eb   :  { %365 = shalt.err (!%p362_p0)
}
 0x1ec   :  { %s366_s4 = scalar_lea.hbm %s480_s5, 32 }
 0x1ed   :  { %p367_p1 = scmp.ne.s32.totalorder %s480_s5, %s366_s4  ;;  %p370_p2 = scmp.lt.u32.totalorder %s366_s4, %s480_s5 }
 0x1ef   :  { %p372_p3 = pnand %p370_p2, %p367_p1 }
 0x1f1   :  { %375 = shalt.err (!%p372_p3)
}
 0x1f2   :  { %239 = dma.vmem_to_hbm [thread:$0]  %s237_s8, 32, %s480_s5, [#allocation4]  }
 0x1f3   :  { %380 = dma.done.wait [#allocation4], 32  }
 0x1f4   :  { %381 = vsyncadd [#allocation4], 4294967264 }
 0x1f5   :  { %243 = vsyncpa [#allocation3], 1 }
 0x1f6   :  { %244 = vsyncpa [#allocation6], 1 }
 0x1f7   :  { %245 = vsyncpa [#allocation4], 1 }

</bundles_post_ra>
